<compile_context>
chip_gen: v5e
topology: v5e:2x2
jax: 0.10.0
libtpu: 0.0.40
codegen_flags: <defaults>
</compile_context>

<pallas_src>
import functools

import jax
import jax.numpy as jnp
from jax.experimental import pallas as pl
from jax.experimental.pallas import tpu as pltpu

# ---------------------------------------------------------------------------
# Constants from the PyTorch module (deterministic, hard-coded).
# ---------------------------------------------------------------------------
C = (0.17393044, 0.15653739, 0.14088365, 0.12679529, 5.51975209,
     4.96777688, 4.4709992, -1.44776001, -1.30298401, 46.05483778)
MAX_ORDER = int((2 * len(C)) ** 0.5 - 1)          # == 3
X_MAX = 0.9
OFFSET = 0.45
N_TERMS = MAX_ORDER + 1                           # == 4


def _poly_weights():
    # Collapse the (i, j) double loop: W[i] = sum_j x_max**j * c[idx].
    w, idx = [], 0
    for i in range(MAX_ORDER + 1):
        wi = 0.0
        for j in range(MAX_ORDER - i + 1):
            wi += (X_MAX ** j) * C[idx]
            idx += 1
        w.append(wi)
    return tuple(w)


W = _poly_weights()


# ---------------------------------------------------------------------------
# Kernels
# ---------------------------------------------------------------------------
def _qv_true_kernel(x_ref, y_ref, dm_ref, o_ref, ycomb_ref):
    """out[tm,tn] = (x[tm,K] @ poly(y)[K,tn]) * dm[tm,tn]."""
    # poly(y) depends only on the (b, n) block -> refresh when the m index
    # resets; reused for every m tile of this (b, n).
    @pl.when(pl.program_id(2) == 0)
    def _():
        ym = y_ref[0].astype(jnp.float32) - OFFSET          # [K, tn], f32 VPU
        yc = W[2] + ym * W[3]                               # Horner form
        yc = W[1] + ym * yc
        yc = W[0] + ym * yc
        ycomb_ref[...] = yc.astype(jnp.bfloat16)

    x = x_ref[0].astype(jnp.bfloat16)                       # [tm, K]
    acc = jnp.dot(x, ycomb_ref[...],
                  preferred_element_type=jnp.float32)       # bf16 MXU, f32 acc
    o_ref[0] = (acc * dm_ref[...].astype(jnp.float32)).astype(o_ref.dtype)


def _qv_false_kernel(x_ref, y_ref, dm_ref, o_ref, rhs_ref, *, fuse):
    """out[tm,tn] = sum_i (x*dm^i)[tm,K] @ (W_i * ym^i)[K,tn]."""
    k = x_ref.shape[2]

    # rhs poly stack depends only on the (b, n) block -> cache across m tiles.
    @pl.when(pl.program_id(2) == 0)
    def _():
        ym = y_ref[0].astype(jnp.float32) - OFFSET          # [K, tn]
        ym2 = ym * ym
        pieces = (jnp.full_like(ym, W[0]),
                  W[1] * ym,
                  W[2] * ym2,
                  W[3] * (ym2 * ym))
        for i, p in enumerate(pieces):
            if fuse:
                rhs_ref[i * k:(i + 1) * k, :] = p.astype(jnp.bfloat16)
            else:
                rhs_ref[i] = p.astype(jnp.bfloat16)

    x = x_ref[0].astype(jnp.float32)                        # [tm, K]
    dm = dm_ref[...].astype(jnp.float32)                    # [tm, K]

    # x * dm^i built as a 3-multiply chain (no separate dm power chain).
    lhs_pieces = []
    xd = x
    for i in range(N_TERMS):
        lhs_pieces.append(xd.astype(jnp.bfloat16))
        if i + 1 < N_TERMS:
            xd = xd * dm

    if fuse:
        # One long-K matmul: lhs [tm, 4K] @ rhs [4K, tn]  (single MXU drain).
        lhs = jnp.concatenate(lhs_pieces, axis=-1)
        acc = jnp.dot(lhs, rhs_ref[...],
                      preferred_element_type=jnp.float32)
    else:
        acc = jnp.dot(lhs_pieces[0], rhs_ref[0],
                      preferred_element_type=jnp.float32)
        for i in range(1, N_TERMS):
            acc = acc + jnp.dot(lhs_pieces[i], rhs_ref[i],
                                preferred_element_type=jnp.float32)
    o_ref[0] = acc.astype(o_ref.dtype)


# ---------------------------------------------------------------------------
# Wrapper
# ---------------------------------------------------------------------------
def _pick_tile(dim, candidates=(256, 128)):
    # 256-class tiles: lane-dense stores and full 256x256 MXU feed on v6e/v7x,
    # still multiples of 128 for v5e. Fall back to the full dim (allowed by
    # the block-shape rule) for small/odd sizes.
    for c in candidates:
        if dim % c == 0:
            return c
    return dim


def dram_mac_temporal_encoding(x, y, qv_mul, decay_mask,
                               *, block_m=None, block_n=None, out_dtype=None):
    """x: [B,H,M,K], y: [B,H,K,N], decay_mask: [M,N] (QV_mul) or [M,K]."""
    B, H, M, K = x.shape
    B2, H2, K2, N = y.shape
    assert (B, H, K) == (B2, H2, K2), "shape mismatch"
    qv_mul = bool(qv_mul)
    out_dtype = x.dtype if out_dtype is None else out_dtype

    dm = jnp.asarray(decay_mask, jnp.float32)
    dm = dm.reshape(dm.shape[-2], dm.shape[-1])   # squeeze [1,1,T,T] -> [T,T]
    if qv_mul:
        assert dm.shape == (M, N), "QV_mul=True expects decay_mask [M, N]"
    else:
        assert dm.shape == (M, K), "QV_mul=False expects decay_mask [M, K]"

    BH = B * H
    xf = x.reshape(BH, M, K)
    yf = y.reshape(BH, K, N)

    tm = block_m if block_m is not None else _pick_tile(M)
    tn = block_n if block_n is not None else _pick_tile(N)
    assert M % tm == 0 and N % tn == 0, "block sizes must divide M / N"

    # m innermost ("arbitrary"): poly(y) scratch is reused across m tiles.
    grid = (BH, N // tn, M // tm)

    if qv_mul:
        kernel = _qv_true_kernel
        dm_spec = pl.BlockSpec((tm, tn), lambda b, n, m: (m, n))
        scratch = [pltpu.VMEM((K, tn), jnp.bfloat16)]
    else:
        fuse = (K % 128 == 0)   # lane-aligned concat -> single fused matmul
        kernel = functools.partial(_qv_false_kernel, fuse=fuse)
        dm_spec = pl.BlockSpec((tm, K), lambda b, n, m: (m, 0))
        if fuse:
            scratch = [pltpu.VMEM((N_TERMS * K, tn), jnp.bfloat16)]
        else:
            scratch = [pltpu.VMEM((N_TERMS, K, tn), jnp.bfloat16)]

    out = pl.pallas_call(
        kernel,
        out_shape=jax.ShapeDtypeStruct((BH, M, N), out_dtype),
        grid_spec=pltpu.PrefetchScalarGridSpec(
            num_scalar_prefetch=0,
            grid=grid,
            in_specs=[
                pl.BlockSpec((1, tm, K), lambda b, n, m: (b, m, 0)),
                pl.BlockSpec((1, K, tn), lambda b, n, m: (b, 0, n)),
                dm_spec,
            ],
            out_specs=pl.BlockSpec((1, tm, tn), lambda b, n, m: (b, m, n)),
            scratch_shapes=scratch,
        ),
        compiler_params=pltpu.CompilerParams(
            # bh / n shard across cores; m carries the scratch reuse -> keep
            # it sequential ("arbitrary") and innermost.
            dimension_semantics=("parallel", "parallel", "arbitrary"),
            vmem_limit_bytes=48 * 1024 * 1024,   # fits v7x 64 MiB physical
        ),
    )(xf, yf, dm)
    return out.reshape(B, H, M, N)


# ---------------------------------------------------------------------------
# Pure-JAX transcription of the PyTorch forward (for validation).
# ---------------------------------------------------------------------------
def _reference(x, y, qv_mul, dm):
    yv = y - OFFSET
    idx = 0
    basis_sum = None
    for i in range(MAX_ORDER + 1):
        for j in range(MAX_ORDER - i + 1):
            if qv_mul:
                term = jnp.matmul(x, yv ** i * (X_MAX ** j) * C[idx]) * dm
            else:
                term = jnp.matmul(x * dm ** i, yv ** i * (X_MAX ** j) * C[idx])
            basis_sum = term if basis_sum is None else basis_sum + term
            idx += 1
    return basis_sum


def _max_rel_err(a, b):
    scale = jnp.maximum(jnp.max(jnp.abs(b)), 1.0)
    return float(jnp.max(jnp.abs(a - b)) / scale)


def _make_decay_mask(t, decay_factor=0.1):
    # Same recipe as the `decay_mask` module: causal mask -> cumsum(dim=-2)-1
    # -> decay ** mask.
    causal = jnp.tril(jnp.ones((t, t), jnp.float32))
    cum = jnp.cumsum(causal, axis=-2) - 1.0
    return jnp.exp(jnp.float32(-decay_factor)) ** cum


if __name__ == "__main__":
    key = jax.random.PRNGKey(0)
    k1, k2, k3, k4, k5, k6 = jax.random.split(key, 6)
    TOL = 2e-2   # bf16 MXU operands vs pure-f32 reference

    # ---- main shapes: exercise tiling + scratch reuse + fused long-K matmul
    B, H, T, HS = 2, 2, 256, 128
    dm = _make_decay_mask(T)

    # QV_mul=True path:  x = Q [B,H,T,hs], y = K^T [B,H,hs,T] -> [B,H,T,T]
    q = jax.random.normal(k1, (B, H, T, HS), jnp.float32) * 0.1
    kT = jax.random.normal(k2, (B, H, HS, T), jnp.float32) * 0.1
    att = dram_mac_temporal_encoding(q, kT, True, dm, block_m=128, block_n=128)

    # QV_mul=False path: x = att [B,H,T,T], y = V [B,H,T,hs] -> [B,H,T,hs]
    aw = jax.random.normal(k3, (B, H, T, T), jnp.float32) * 0.1
    v = jax.random.normal(k4, (B, H, T, HS), jnp.float32) * 0.1
    out = dram_mac_temporal_encoding(aw, v, False, dm, block_m=128, block_n=128)

    jax.block_until_ready((att, out))

    e1 = _max_rel_err(att, _reference(q, kT, True, dm))
    e2 = _max_rel_err(out, _reference(aw, v, False, dm))
    assert e1 < TOL, f"QV_mul=True mismatch: {e1}"
    assert e2 < TOL, f"QV_mul=False mismatch: {e2}"

    # ---- tiny shapes: exercise full-dim (untiled) blocks + non-fused K path
    Ts, HSs = 8, 16
    dms = _make_decay_mask(Ts)
    qs = jax.random.normal(k5, (B, H, Ts, HSs), jnp.float32) * 0.1
    ks = jax.random.normal(k6, (B, H, HSs, Ts), jnp.float32) * 0.1
    att_s = dram_mac_temporal_encoding(qs, ks, True, dms)
    aws = jax.random.normal(k3, (B, H, Ts, Ts), jnp.float32) * 0.1
    vs = jax.random.normal(k4, (B, H, Ts, HSs), jnp.float32) * 0.1
    out_s = dram_mac_temporal_encoding(aws, vs, False, dms)
    jax.block_until_ready((att_s, out_s))

    e3 = _max_rel_err(att_s, _reference(qs, ks, True, dms))
    e4 = _max_rel_err(out_s, _reference(aws, vs, False, dms))
    assert e3 < TOL, f"tiny QV_mul=True mismatch: {e3}"
    assert e4 < TOL, f"tiny QV_mul=False mismatch: {e4}"

    print("KERNEL_OK")
</pallas_src>

<mosaic_0001>
module attributes {stable_mosaic.version = 11 : i64} {
  func.func @_qv_true_kernel(%arg0: i32, %arg1: i32, %arg2: i32, %arg3: memref<1x128x128xf32, #tpu.memory_space<vmem>>, %arg4: memref<1x128x128xf32, #tpu.memory_space<vmem>>, %arg5: memref<128x128xf32, #tpu.memory_space<vmem>>, %arg6: memref<1x128x128xf32, #tpu.memory_space<vmem>>, %arg7: memref<128x128xbf16, #tpu.memory_space<vmem>>) attributes {dimension_semantics = [#tpu.dimension_semantics<parallel>, #tpu.dimension_semantics<parallel>, #tpu.dimension_semantics<arbitrary>], iteration_bounds = array<i64: 4, 2, 2>, scalar_prefetch = 0 : i64, scratch_operands = 1 : i64, tpu.core_type = #tpu.core_type<tc>, window_params = [{transform_indices = @transform_0, window_bounds = array<i64: 1, 128, 128>}, {transform_indices = @transform_1, window_bounds = array<i64: 1, 128, 128>}, {transform_indices = @transform_2, window_bounds = array<i64: 128, 128>}, {transform_indices = @transform_3, window_bounds = array<i64: 1, 128, 128>}]} {
    %c0_i32 = arith.constant 0 : i32
    %0 = arith.cmpi eq, %arg2, %c0_i32 : i32
    %1 = arith.extui %0 : i1 to i32
    %c0_i32_0 = arith.constant 0 : i32
    %2 = arith.cmpi ne, %1, %c0_i32_0 : i32
    scf.if %2 {
      %c0_10 = arith.constant 0 : index
      %c0_11 = arith.constant 0 : index
      %c0_12 = arith.constant 0 : index
      %13 = vector.load %arg4[%c0_10, %c0_11, %c0_12] : memref<1x128x128xf32, #tpu.memory_space<vmem>>, vector<1x128x128xf32>
      %14 = vector.shape_cast %13 : vector<1x128x128xf32> to vector<128x128xf32>
      %cst_13 = arith.constant 4.500000e-01 : f32
      %15 = vector.broadcast %cst_13 : f32 to vector<128x128xf32>
      %16 = arith.subf %14, %15 : vector<128x128xf32>
      %cst_14 = arith.constant 46.0548363 : f32
      %17 = vector.broadcast %cst_14 : f32 to vector<128x128xf32>
      %18 = arith.mulf %16, %17 : vector<128x128xf32>
      %cst_15 = arith.constant -2.62044573 : f32
      %19 = vector.broadcast %cst_15 : f32 to vector<128x128xf32>
      %20 = arith.addf %19, %18 : vector<128x128xf32>
      %21 = arith.mulf %16, %20 : vector<128x128xf32>
      %cst_16 = arith.constant 13.6122608 : f32
      %22 = vector.broadcast %cst_16 : f32 to vector<128x128xf32>
      %23 = arith.addf %22, %21 : vector<128x128xf32>
      %24 = arith.mulf %16, %23 : vector<128x128xf32>
      %cst_17 = arith.constant 0.521363616 : f32
      %25 = vector.broadcast %cst_17 : f32 to vector<128x128xf32>
      %26 = arith.addf %25, %24 : vector<128x128xf32>
      %27 = arith.truncf %26 : vector<128x128xf32> to vector<128x128xbf16>
      %c0_18 = arith.constant 0 : index
      %c0_19 = arith.constant 0 : index
      %28 = vector.load %arg7[%c0_18, %c0_19] : memref<128x128xbf16, #tpu.memory_space<vmem>>, vector<128x128xbf16>
      tpu.vector_store %arg7[%c0_18, %c0_19], %27 {strides = array<i32>} : memref<128x128xbf16, #tpu.memory_space<vmem>>, vector<128x128xbf16>,
    } else {
    }
    %c0 = arith.constant 0 : index
    %c0_1 = arith.constant 0 : index
    %c0_2 = arith.constant 0 : index
    %3 = vector.load %arg3[%c0, %c0_1, %c0_2] : memref<1x128x128xf32, #tpu.memory_space<vmem>>, vector<1x128x128xf32>
    %4 = vector.shape_cast %3 : vector<1x128x128xf32> to vector<128x128xf32>
    %5 = arith.truncf %4 : vector<128x128xf32> to vector<128x128xbf16>
    %c0_3 = arith.constant 0 : index
    %c0_4 = arith.constant 0 : index
    %6 = vector.load %arg7[%c0_3, %c0_4] : memref<128x128xbf16, #tpu.memory_space<vmem>>, vector<128x128xbf16>
    %cst = arith.constant dense<0.000000e+00> : vector<128x128xf32>
    %7 = tpu.matmul %5, %6, %cst {dimension_numbers = #tpu.dot_dimension_numbers<[1], [0], [0], [1], [0, 0, 1, 1], [], []>} : vector<128x128xbf16>, vector<128x128xbf16>, vector<128x128xf32> -> vector<128x128xf32>
    %c0_5 = arith.constant 0 : index
    %c0_6 = arith.constant 0 : index
    %8 = vector.load %arg5[%c0_5, %c0_6] : memref<128x128xf32, #tpu.memory_space<vmem>>, vector<128x128xf32>
    %9 = arith.mulf %7, %8 : vector<128x128xf32>
    %c0_7 = arith.constant 0 : index
    %c0_8 = arith.constant 0 : index
    %c0_9 = arith.constant 0 : index
    %10 = vector.load %arg6[%c0_7, %c0_8, %c0_9] : memref<1x128x128xf32, #tpu.memory_space<vmem>>, vector<1x128x128xf32>
    %11 = vector.shape_cast %10 : vector<1x128x128xf32> to vector<128x128xf32>
    %12 = vector.shape_cast %9 : vector<128x128xf32> to vector<1x128x128xf32>
    tpu.vector_store %arg6[%c0_7, %c0_8, %c0_9], %12 {strides = array<i32>} : memref<1x128x128xf32, #tpu.memory_space<vmem>>, vector<1x128x128xf32>,
    return
  }
  func.func @transform_0(%arg0: i32, %arg1: i32, %arg2: i32) -> (i32, i32, i32) {
    %c0_i32 = arith.constant 0 : i32
    %c0_i32_0 = arith.constant 0 : i32
    return %arg0, %arg2, %c0_i32 : i32, i32, i32
  }
  func.func @transform_1(%arg0: i32, %arg1: i32, %arg2: i32) -> (i32, i32, i32) {
    %c0_i32 = arith.constant 0 : i32
    %c0_i32_0 = arith.constant 0 : i32
    return %arg0, %c0_i32, %arg1 : i32, i32, i32
  }
  func.func @transform_2(%arg0: i32, %arg1: i32, %arg2: i32) -> (i32, i32) {
    %c0_i32 = arith.constant 0 : i32
    return %arg2, %arg1 : i32, i32
  }
  func.func @transform_3(%arg0: i32, %arg1: i32, %arg2: i32) -> (i32, i32, i32) {
    %c0_i32 = arith.constant 0 : i32
    return %arg0, %arg2, %arg1 : i32, i32, i32
  }
}

</mosaic_0001>

<bundles_post_ra>
// kernel: tpu_custom_call.1
= control target key start
LH: loop header
LB: loop body
LE: loop exit
PB: predicated region body
PF: predicated region fallthrough
CT: control target
= control target key end

     0   :  { %s1909_s0 = inlined_call_operand.hbm [shape: f32[4,256,128], index: 0, kind: input, shape index: {}]   ;;  %s1910_s1 = inlined_call_operand.hbm [shape: f32[4,128,256], index: 1, kind: input, shape index: {}]   ;;  %s1911_s2 = inlined_call_operand.hbm [shape: f32[256,256], index: 2, kind: input, shape index: {}]   ;;  %s1912_s3 = inlined_call_operand.hbm [shape: f32[4,256,256], index: 3, kind: output, shape index: {}]  }
   0x1   :  { %1938 = sst [smem:[#allocation31_spill]] %s1909_s0 }
   0x2   :  { %1939 = sst [smem:[#allocation32_spill]] %s1910_s1 }
   0x3   :  { %1940 = sst [smem:[#allocation33_spill]] %s1912_s3 }
   0x4   :  { %8 = vsyncpa [#allocation4], 0 }
   0x5   :  { %10 = vsyncpa [#allocation4 + $0x1], 0 }
   0x6   :  { %11 = vsyncpa [#allocation7], 0 }
   0x7   :  { %13 = vsyncpa [#allocation7 + $0x1], 0 }
   0x8   :  { %14 = vsyncpa [#allocation5], 0 }
   0x9   :  { %16 = vsyncpa [#allocation5 + $0x1], 0  ;;  %s1473_s12 = smov 0   ;;  %s1475_s13 = smov 0  }
   0xa   :  { %s1477_s14 = smov 0   ;;  %s1479_s15 = smov 0  }
   0xb   :  { %s1481_s16 = smov 0   ;;  %s1483_s17 = smov 0  }
   0xc   :  { %s1485_s18 = smov 0   ;;  %s1487_s19 = smov 0  }
   0xd   :  { %s1489_s20 = smov 0   ;;  %s1491_s21 = smov 0  }
   0xe   :  { %s1493_s22 = smov 0   ;;  %s1495_s23 = smov 0  }
   0xf   :  { %s1497_s24 = smov 0   ;;  %s1499_s25 = smov 0  }
  0x10   :  { %s1501_s26 = smov 0   ;;  %s1503_s27 = smov 0  }
  0x11   :  { %s1505_s28 = smov 0   ;;  %s1507_s29 = smov 0  }
  0x12   :  { %s1509_s30 = smov 0  }
  0x13 LB: > { %1941 = sst [smem:[#allocation14_spill]] %s1373_s12  ;;  %s1567_s4 = sadd.s32 4294967295, %s1445_s30   ;;  %s1445_s30 = sphi %s1509_s30, %s22_s30   ;;  %s1441_s29 = sphi %s1507_s29, %s2003_s29   ;;  %s1437_s28 = sphi %s1505_s28, %s2013_s28   ;;  %s1433_s27 = sphi %s1503_s27, %s2012_s27   ;;  %s1429_s26 = sphi %s1501_s26, %s1999_s26   ;;  %s1425_s25 = sphi %s1499_s25, %s2011_s25   ;;  %s1421_s24 = sphi %s1497_s24, %s2010_s24   ;;  %s1417_s23 = sphi %s1495_s23, %s1998_s23   ;;  %s1413_s22 = sphi %s1493_s22, %s1997_s22   ;;  %s1409_s21 = sphi %s1491_s21, %s1996_s21   ;;  %s1405_s20 = sphi %s1489_s20, %s2009_s20   ;;  %s1401_s19 = sphi %s1487_s19, %s2008_s19   ;;  %s1397_s18 = sphi %s1485_s18, %s1994_s18   ;;  %s1393_s17 = sphi %s1483_s17, %s2007_s17   ;;  %s1389_s16 = sphi %s1481_s16, %s2006_s16   ;;  %s1385_s15 = sphi %s1479_s15, %s2005_s15   ;;  %s1381_s14 = sphi %s1477_s14, %s2004_s14   ;;  %s1377_s13 = sphi %s1475_s13, %s2002_s13   ;;  %s1373_s12 = sphi %s1473_s12, %s1993_s12  }
  0x14   : > { %1942 = sst [smem:[#allocation15_spill]] %s1377_s13  ;;  %p58_p0 = scmp.eq.s32.totalorder %s1445_s30, 0 }
  0x15   : > { %1943 = sst [smem:[#allocation16_spill]] %s1401_s19  ;;  %p1927_p1 = scmp.eq.s32.totalorder %s1567_s4, 0 }
  0x16   : > { %1944 = sst [smem:[#allocation17_spill]] %s1413_s22  ;;  %p85_p2 = scmp.ne.s32.totalorder %s1405_s20, %s1401_s19 }
  0x17   : > { %1945 = sst [smem:[#allocation18_spill]] %s1417_s23  ;;  %p91_p3 = scmp.ne.s32.totalorder %s1401_s19, %s1397_s18 }
  0x18   : > { %1946 = sst [smem:[#allocation19_spill]] %s1421_s24  ;;  %p147_p4 = scmp.eq.s32.totalorder %s1567_s4, 15 }
  0x19   : > { %1947 = sst [smem:[#allocation20_spill]] %s1425_s25  ;;  %p1580_p5 = por %p85_p2, %p58_p0 }
  0x1a   : > { %1948 = sst [smem:[#allocation21_spill]] %s1429_s26  ;;  %p1586_p6 = por %p91_p3, %p1927_p1 }
  0x1b   : > { %1949 = sst [smem:[#allocation22_spill]] %s1441_s29  ;;  %p1001_p7 = scmp.lt.s32.totalorder %s1445_s30, 16 }
  0x1c   : > { %s1951_s9 = scalar_select %p1586_p6, 1, 0 }
  0x1d   : > { %s1922_s10 = sshll.u32 %s1441_s29, 5  ;;  %s197_s11 = sand.u32 1, %s1445_s30  }
  0x1e   : > { %1952 = sst [smem:[#allocation23_spill]] %s1951_s9  ;;  %s199_s7 = sand.u32 1, %s1405_s20  }
  0x1f   : > { %s830_s6 = sshll.u32 %s199_s7, 7  ;;  %s205_s18 = sadd.s32 %s1437_s28, %s1922_s10 }
  0x20   : > { %s832_s5 = sshll.u32 %s205_s18, 3  ;;  %s201_s3 = scalar_lea.vmem [#allocation6], %s830_s6 }
  0x21   : > { %s210_s26 = sshll.u32 %s201_s3, 4  ;;  %s1953_s1 = sld [smem:[#allocation32_spill]]  ;;  %s211_s26 = int_to_ptr.vmem [resolvable:$true] %s210_s26 }
  0x22   : > { %p991_p8 = pnand %p1001_p7, %p1580_p5  ;;  %p837_p9 = scmp.ge.s32.totalorder %s1445_s30, 1 }
  0x23   : > { %s1605_s3 = scalar_lea.sflag [#allocation7], %s197_s11  ;;  %s1917_s24 = smov 256  }
  0x24   : > { %s1918_s25 = smov 128   ;;  %p242_p10 = scmp.lt.s32.totalorder %s1445_s30, 17 }
  0x25   : > { %s823_s6 = sadd.s32 4294967294, %s1445_s30   ;;  %s34_s7 = sadd.s32 1, %s1433_s27 }
  0x26   : > { %p1612_p11 = pnand %p837_p9, %p242_p10  ;;  %p35_p12 = scmp.ge.s32.totalorder %s34_s7, 2 }
  0x27   : > { %s207_s19 = scalar_lea.hbm %s1953_s1, %s832_s5  ;;  %s1920_s5 = smov 8  }
  0x28   : > { %s208_s9 = sshll.u32 %s207_s19, 4  ;;  %p57_p13 = scmp.ne.s32.totalorder %s1417_s23, %s1413_s22  ;;  %s209_s9 = int_to_ptr.hbm [resolvable:$true] %s208_s9 }
  0x29   : > { %993 = dma.hbm_to_vmem [thread:$0]  (!%p991_p8), %s209_s9, 2048, %s211_s26, %s1605_s3, %s1917_s24, %s1918_s25, %s1920_s5  }
  0x2a   : > { %s1954_s19 = scalar_select %p1612_p11, 1, 0 }
  0x2b   : > { %p63_p2 = scmp.ne.s32.totalorder %s1413_s22, %s1409_s21  ;;  %s2015_s7 = smov (%p35_p12, %s34_s7), 0 }
  0x2c   : > { %1955 = sst [smem:[#allocation24_spill]] %s1954_s19  ;;  %s1957_s26 = sadd.s32 1, %s1437_s28 }
  0x2d   : > { %1956 = sst [smem:[#allocation25_spill]] %s2015_s7  ;;  %s2017_s26 = smov (!%p35_p12, %s1957_s26), %s1437_s28 }
  0x2e   : > { %s46_s9 = ssub.s32 %s1433_s27, %s2015_s7  ;;  %p1632_p3 = por %p58_p0, %p57_p13 }
  0x2f   : > { %p39_p5 = scmp.ge.s32.totalorder %s2017_s26, 2  ;;  %p1638_p8 = por %p1927_p1, %p63_p2 }
  0x30   : > { %s136_s21 = sadd.s32 1, %s1381_s14  ;;  %p146_p9 = scmp.ne.s32.totalorder %s1381_s14, %s1377_s13 }
  0x31   : > { %s1959_s18 = scalar_select %p1638_p8, 1, 0 }
  0x32   : > { %s2019_s26 = smov (%p39_p5, %s2017_s26), 0  ;;  %s1962_s24 = sadd.s32 1, %s1441_s29 }
  0x33   : > { %1960 = sst [smem:[#allocation26_spill]] %s1959_s18  ;;  %s2021_s24 = smov (!%p39_p5, %s1962_s24), %s1441_s29 }
  0x34   : > { %1961 = sst [smem:[#allocation27_spill]] %s2019_s26  ;;  %s74_s25 = ssub.s32 %s1437_s28, %s2019_s26 }
  0x35   : > { %p1654_p10 = por %p147_p4, %p146_p9  ;;  %p43_p12 = scmp.ge.s32.totalorder %s2021_s24, 4 }
  0x36   : > { %s103_s10 = sor.u32 %s74_s25, %s46_s9  ;;  %p152_p2 = scmp.ne.s32.totalorder %s1377_s13, %s1373_s12 }
  0x37   : > { %s1963_s5 = scalar_select %p1654_p10, 1, 0 }
  0x38   : > { %p1658_p13 = scmp.eq.s32.totalorder %s103_s10, 0  ;;  %s2023_s24 = smov (%p43_p12, %s2021_s24), 0 }
  0x39   : > { %1964 = sst [smem:[#allocation28_spill]] %s1963_s5  ;;  %p153_p5 = scmp.eq.s32.totalorder %s823_s6, 15 }
  0x3a   : > { %1966 = sst [smem:[#allocation29_spill]] %s2023_s24  ;;  %s173_s1 = sand.u32 1, %s1417_s23  }
  0x3b   : > { %s45_s26 = ssub.s32 %s1441_s29, %s2023_s24  ;;  %p1669_p1 = por %p153_p5, %p152_p2 }
  0x3c   : > { %s47_s7 = sor.u32 %s46_s9, %s45_s26  ;;  %s75_s5 = sor.u32 %s74_s25, %s45_s26 }
  0x3d   : > { %p48_p4 = scmp.eq.s32.totalorder %s47_s7, 0  ;;  %p76_p9 = scmp.eq.s32.totalorder %s75_s5, 0 }
  0x3e   : > { %s133_s10 = sor.u32 %s74_s25, %s47_s7  ;;  %s1968_s12 = sadd.s32 1, %s1417_s23 }
  0x3f   : > { %s1676_s13 = scalar_select %p48_p4, %s1417_s23, %s1968_s12  }
  0x40   : > { %s1970_s22 = sadd.s32 1, %s1405_s20  ;;  %p134_p12 = scmp.eq.s32.totalorder %s133_s10, 0 }
  0x41   : > { %1969 = sst [smem:[#allocation30_spill]] %s1676_s13  ;;  %s826_s6 = sshll.u32 %s173_s1, 7 }
  0x42   : > { %s1681_s19 = scalar_select %p76_p9, %s1405_s20, %s1970_s22  }
  0x43   : > { %s827_s26 = sshll.u32 %s1433_s27, 4  ;;  %s1971_s5 = sshll.u32 %s1441_s29, 5 }
  0x44   : > { %s1685_s25 = scalar_select %p134_p12, %s1381_s14, %s136_s21  }
  0x45   : > { %s182_s7 = sadd.s32 %s1971_s5, %s827_s26  ;;  %s177_s12 = scalar_lea.vmem [#allocation3], %s826_s6 }
  0x46   : > { %s187_s22 = sshll.u32 %s177_s12, 4  ;;  %s829_s9 = sshll.u32 %s182_s7, 3  ;;  %s188_s22 = int_to_ptr.vmem [resolvable:$true] %s187_s22 }
  0x47   : > { %s1972_s0 = sld [smem:[#allocation31_spill]]  ;;  %p988_p2 = pnand %p1001_p7, %p1632_p3 }
  0x48   : > { %s174_s29 = scalar_lea.sflag [#allocation4], %s173_s1  ;;  %s1973_s23 = smov 8  }
  0x49   : > { %s1974_s26 = smov 128   ;;  %s106_s6 = sadd.s32 1, %s1393_s17 }
  0x4a   : > { %s1703_s5 = scalar_select %p1658_p13, %s1393_s17, %s106_s6  }
  0x4b   : > { %p113_p5 = scmp.ne.s32.totalorder %s1393_s17, %s1389_s16  ;;  %p119_p4 = scmp.ne.s32.totalorder %s1389_s16, %s1385_s15 }
  0x4c   : > { %s222_s24 = sand.u32 1, %s1393_s17   ;;  %s898_s7 = sshll.u32 %s1433_s27, 5 }
  0x4d   : > { %s184_s13 = scalar_lea.hbm %s1972_s0, %s829_s9  ;;  %p115_p9 = por %p113_p5, %p58_p0 }
  0x4e   : > { %s185_s21 = sshll.u32 %s184_s13, 4  ;;  %p1975_p3 = scmp.eq.s32.totalorder %s1567_s4, 0  ;;  %s186_s21 = int_to_ptr.hbm [resolvable:$true] %s185_s21 }
  0x4f   : > { %990 = dma.hbm_to_vmem [thread:$0]  (!%p988_p2), %s186_s21, 2048, %s188_s22, %s174_s29, %s1974_s26, %s1974_s26, %s1973_s23  }
  0x50   : > { %p1715_p12 = por %p119_p4, %p1975_p3  ;;  %s833_s1 = sshll.u32 %s222_s24, 7 }
  0x51   : > { %s229_s11 = sadd.s32 %s1437_s28, %s898_s7  ;;  %s224_s9 = scalar_lea.vmem [#allocation8], %s833_s1 }
  0x52   : > { %s836_s29 = sshll.u32 %s229_s11, 3  ;;  %s234_s10 = sshll.u32 %s224_s9, 4  ;;  %s235_s10 = int_to_ptr.vmem [resolvable:$true] %s234_s10 }
  0x53   : > { %s231_s22 = scalar_lea.hbm %s1911_s2, %s836_s29  ;;  %p994_p13 = pnand %p1001_p7, %p115_p9 }
  0x54   : > { %s232_s21 = sshll.u32 %s231_s22, 4  ;;  %s1977_s15 = smov 256   ;;  %s233_s21 = int_to_ptr.hbm [resolvable:$true] %s232_s21 }
  0x55   : > { %996 = dma.hbm_to_vmem [thread:$0]  (!%p994_p13), %s233_s21, 2048, %s235_s10, %s1605_s3, %s1977_s15, %s1974_s26, %s1973_s23  }
  0x56   : > { %246 = sbr.rel (%p1612_p11) target bundleno = 370 (0x172), region = 32  ;;  %s1979_s24 = sld [smem:[#allocation17_spill]] (!%p1612_p11) }
  0x5c   : > { %s248_s11 = sand.u32 1, %s1979_s24  }
  0x5d   : > { %s838_s0 = sshll.u32 %s248_s11, 7  ;;  %s249_s12 = scalar_lea.sflag [#allocation4], %s248_s11 }
  0x5e   : > { %s1732_s29 = scalar_lea.vmem [#allocation3], %s838_s0 }
  0x5f   : > { %1356 = dma.done.wait (%p1638_p8), %s249_s12, 2048  }
  0x60   : > { %1358 = vsyncadd (%p1638_p8), %s249_s12, 4294965248  ;;  %s1981_s1 = sld [smem:[#allocation16_spill]]  ;;  %s258_s22 = sand.u32 1, %s1567_s4  }
  0x61   : > { %s259_s26 = scalar_lea.sflag [#allocation7], %s258_s22 }
  0x66   : > { %s260_s23 = sand.u32 1, %s1981_s1  }
  0x67   : > { %s839_s3 = sshll.u32 %s260_s23, 7 }
  0x68   : > { %s1740_s9 = scalar_lea.vmem [#allocation6], %s839_s3 }
  0x69   : > { %1360 = dma.done.wait (%p1586_p6), %s259_s26, 2048  }
  0x6a   : > { %1362 = vsyncadd (%p1586_p6), %s259_s26, 4294965248  ;;  %s270_s0 = sand.u32 1, %s1389_s16  }
  0x6b   : > { %s840_s10 = sshll.u32 %s270_s0, 7 }
  0x6c   : > { %s1747_s21 = scalar_lea.vmem [#allocation8], %s840_s10 }
  0x6d   : > { %1364 = dma.done.wait (%p1715_p12), %s259_s26, 2048  }
  0x6e   : > { %1366 = vsyncadd (%p1715_p12), %s259_s26, 4294965248  ;;  %s1983_s4 = sld [smem:[#allocation15_spill]] }
  0x6f   : > { %s1984_s7 = sld [smem:[#allocation19_spill]] }
  0x74   : > { %s303_s15 = sand.u32 1, %s1983_s4  }
  0x75   : > { %s841_s6 = sshll.u32 %s303_s15, 7  ;;  %p842_p0 = scmp.ne.s32.totalorder %s1984_s7, 0 }
  0x76   : > { %s1756_s24 = scalar_lea.vmem [#allocation9], %s841_s6 }
  0x77   : > { %312 = sbr.rel (%p842_p0) target bundleno = 167 (0xa7), region = 48 }
  0x7c   : > { %v313_v0 = vld [vmem:[%s1740_s9] sm:$0xff]  ;;  %v314_v1 = vld [vmem:[%s1740_s9 + $0x8] sm:$0xff]  ;;  %v315_v2 = vld [vmem:[%s1740_s9 + $0x10] sm:$0xff] }
  0x7d   : > { %v843_v3 = vadd.f32 -0.45, %v313_v0  ;;  %v844_v4 = vadd.f32 -0.45, %v314_v1  ;;  %v316_v5 = vld [vmem:[%s1740_s9 + $0x18] sm:$0xff]  ;;  %v317_v6 = vld [vmem:[%s1740_s9 + $0x20] sm:$0xff] }
  0x7e   : > { %v845_v7 = vadd.f32 -0.45, %v315_v2  ;;  %v846_v8 = vadd.f32 -0.45, %v316_v5  ;;  %v318_v9 = vld [vmem:[%s1740_s9 + $0x28] sm:$0xff]  ;;  %v319_v10 = vld [vmem:[%s1740_s9 + $0x30] sm:$0xff] }
  0x7f   : > { %v345_v11 = vmul.f32 46.054836, %v843_v3  ;;  %v346_v12 = vmul.f32 46.054836, %v844_v4  ;;  %v847_v13 = vadd.f32 -0.45, %v317_v6 }
  0x80   : > { %v347_v14 = vmul.f32 46.054836, %v845_v7  ;;  %v348_v15 = vmul.f32 46.054836, %v846_v8  ;;  %v848_v16 = vadd.f32 -0.45, %v318_v9 }
  0x81   : > { %v361_v17 = vadd.f32 -2.6204457, %v345_v11  ;;  %v362_v18 = vadd.f32 -2.6204457, %v346_v12  ;;  %v349_v19 = vmul.f32 46.054836, %v847_v13 }
  0x82   : > { %v363_v20 = vadd.f32 -2.6204457, %v347_v14  ;;  %v364_v21 = vadd.f32 -2.6204457, %v348_v15  ;;  %v350_v22 = vmul.f32 46.054836, %v848_v16 }
  0x83   : > { %v377_v23 = vmul.f32 %v843_v3, %v361_v17  ;;  %v378_v24 = vmul.f32 %v844_v4, %v362_v18  ;;  %v365_v25 = vadd.f32 -2.6204457, %v349_v19  ;;  %v320_v26 = vld [vmem:[%s1740_s9 + $0x38] sm:$0xff]  ;;  %v849_v27 = vadd.f32 -0.45, %v319_v10  ;;  %v321_v48 = vld [vmem:[%s1740_s9 + $0x40] sm:$0xff] }
  0x84   : > { %v379_v28 = vmul.f32 %v845_v7, %v363_v20  ;;  %v380_v29 = vmul.f32 %v846_v8, %v364_v21  ;;  %v366_v30 = vadd.f32 -2.6204457, %v350_v22  ;;  %v850_v31 = vadd.f32 -0.45, %v320_v26  ;;  %v322_v53 = vld [vmem:[%s1740_s9 + $0x48] sm:$0xff]  ;;  %v323_v58 = vld [vmem:[%s1740_s9 + $0x50] sm:$0xff] }
  0x85   : > { %v393_v32 = vadd.f32 13.612261, %v377_v23  ;;  %v394_v33 = vadd.f32 13.612261, %v378_v24  ;;  %v381_v34 = vmul.f32 %v847_v13, %v365_v25  ;;  %v351_v35 = vmul.f32 46.054836, %v849_v27 }
  0x86   : > { %v395_v36 = vadd.f32 13.612261, %v379_v28  ;;  %v396_v37 = vadd.f32 13.612261, %v380_v29  ;;  %v382_v38 = vmul.f32 %v848_v16, %v366_v30  ;;  %v352_v39 = vmul.f32 46.054836, %v850_v31 }
  0x87   : > { %v409_v40 = vmul.f32 %v843_v3, %v393_v32  ;;  %v410_v41 = vmul.f32 %v844_v4, %v394_v33  ;;  %v397_v42 = vadd.f32 13.612261, %v381_v34  ;;  %v367_v43 = vadd.f32 -2.6204457, %v351_v35  ;;  %v324_v59 = vld [vmem:[%s1740_s9 + $0x58] sm:$0xff]  ;;  %v325_v4 = vld [vmem:[%s1740_s9 + $0x60] sm:$0xff] }
  0x88   : > { %v411_v44 = vmul.f32 %v845_v7, %v395_v36  ;;  %v412_v45 = vmul.f32 %v846_v8, %v396_v37  ;;  %v398_v46 = vadd.f32 13.612261, %v382_v38  ;;  %v368_v47 = vadd.f32 -2.6204457, %v352_v39  ;;  %v326_v8 = vld [vmem:[%s1740_s9 + $0x68] sm:$0xff]  ;;  %v328_v26 = vld [vmem:[%s1740_s9 + $0x78] sm:$0xff] }
  0x89   : > { %v425_v49 = vadd.f32 0.5213636, %v409_v40  ;;  %v426_v50 = vadd.f32 0.5213636, %v410_v41  ;;  %v413_v51 = vmul.f32 %v847_v13, %v397_v42  ;;  %v383_v52 = vmul.f32 %v849_v27, %v367_v43  ;;  %v327_v13 = vld [vmem:[%s1740_s9 + $0x70] sm:$0xff] }
  0x8a   : > { %v427_v54 = vadd.f32 0.5213636, %v411_v44  ;;  %v428_v55 = vadd.f32 0.5213636, %v412_v45  ;;  %v414_v56 = vmul.f32 %v848_v16, %v398_v46  ;;  %v384_v57 = vmul.f32 %v850_v31, %v368_v47 }
  0x8b   : > { %v911_v60 = vpack.c.bf16 %v426_v50, %v425_v49  ;;  %v429_v61 = vadd.f32 0.5213636, %v413_v51  ;;  %v399_v62 = vadd.f32 13.612261, %v383_v52  ;;  %v851_v63 = vadd.f32 -0.45, %v321_v48 }
  0x8c   : > { %v916_v0 = vpack.c.bf16 %v428_v55, %v427_v54  ;;  %v430_v1 = vadd.f32 0.5213636, %v414_v56  ;;  %v400_v2 = vadd.f32 13.612261, %v384_v57  ;;  %v852_v3 = vadd.f32 -0.45, %v322_v53 }
  0x8d   : > { %912 = vst [vmem:[#allocation2 + $0x30] sm:$0xff] %v911_v60   ;;  %v415_v5 = vmul.f32 %v849_v27, %v399_v62  ;;  %v353_v6 = vmul.f32 46.054836, %v851_v63  ;;  %v853_v7 = vadd.f32 -0.45, %v323_v58 }
  0x8e   : > { %948 = vst [vmem:[#allocation2] sm:$0xff] %v916_v0   ;;  %v921_v9 = vpack.c.bf16 %v430_v1, %v429_v61  ;;  %v416_v10 = vmul.f32 %v850_v31, %v400_v2  ;;  %v354_v11 = vmul.f32 46.054836, %v852_v3  ;;  %v854_v12 = vadd.f32 -0.45, %v324_v59 }
  0x8f   : > { %v431_v14 = vadd.f32 0.5213636, %v415_v5  ;;  %v369_v15 = vadd.f32 -2.6204457, %v353_v6  ;;  %v355_v16 = vmul.f32 46.054836, %v853_v7 }
  0x90   : > { %949 = vst [vmem:[#allocation2 + $0x18] sm:$0xff] %v921_v9   ;;  %v432_v17 = vadd.f32 0.5213636, %v416_v10  ;;  %v370_v18 = vadd.f32 -2.6204457, %v354_v11 }
  0x91   : > { %v385_v19 = vmul.f32 %v851_v63, %v369_v15  ;;  %v356_v20 = vmul.f32 46.054836, %v854_v12  ;;  %v371_v21 = vadd.f32 -2.6204457, %v355_v16  ;;  %v855_v22 = vadd.f32 -0.45, %v325_v4 }
  0x92   : > { %v926_v23 = vpack.c.bf16 %v432_v17, %v431_v14  ;;  %v386_v24 = vmul.f32 %v852_v3, %v370_v18  ;;  %v856_v25 = vadd.f32 -0.45, %v326_v8  ;;  %v857_v27 = vadd.f32 -0.45, %v327_v13 }
  0x93   : > { %v401_v28 = vadd.f32 13.612261, %v385_v19  ;;  %v372_v29 = vadd.f32 -2.6204457, %v356_v20  ;;  %v387_v30 = vmul.f32 %v853_v7, %v371_v21  ;;  %v357_v31 = vmul.f32 46.054836, %v855_v22 }
  0x94   : > { %950 = vst [vmem:[#allocation2 + $0x10] sm:$0xff] %v926_v23   ;;  %v402_v32 = vadd.f32 13.612261, %v386_v24  ;;  %v358_v33 = vmul.f32 46.054836, %v856_v25 }
  0x95   : > { %v417_v34 = vmul.f32 %v851_v63, %v401_v28  ;;  %v388_v35 = vmul.f32 %v854_v12, %v372_v29  ;;  %v403_v36 = vadd.f32 13.612261, %v387_v30  ;;  %v373_v37 = vadd.f32 -2.6204457, %v357_v31 }
  0x96   : > { %v418_v38 = vmul.f32 %v852_v3, %v402_v32  ;;  %v374_v39 = vadd.f32 -2.6204457, %v358_v33  ;;  %v858_v40 = vadd.f32 -0.45, %v328_v26  ;;  %v359_v41 = vmul.f32 46.054836, %v857_v27 }
  0x97   : > { %v433_v42 = vadd.f32 0.5213636, %v417_v34  ;;  %v404_v43 = vadd.f32 13.612261, %v388_v35  ;;  %v419_v44 = vmul.f32 %v853_v7, %v403_v36  ;;  %v389_v45 = vmul.f32 %v855_v22, %v373_v37 }
  0x98   : > { %v434_v46 = vadd.f32 0.5213636, %v418_v38  ;;  %v390_v47 = vmul.f32 %v856_v25, %v374_v39  ;;  %v360_v48 = vmul.f32 46.054836, %v858_v40  ;;  %v375_v49 = vadd.f32 -2.6204457, %v359_v41 }
  0x99   : > { %v420_v50 = vmul.f32 %v854_v12, %v404_v43  ;;  %v435_v51 = vadd.f32 0.5213636, %v419_v44  ;;  %v405_v52 = vadd.f32 13.612261, %v389_v45 }
  0x9a   : > { %v931_v53 = vpack.c.bf16 %v434_v46, %v433_v42  ;;  %v406_v54 = vadd.f32 13.612261, %v390_v47  ;;  %v376_v55 = vadd.f32 -2.6204457, %v360_v48  ;;  %v391_v56 = vmul.f32 %v857_v27, %v375_v49 }
  0x9b   : > { %v436_v57 = vadd.f32 0.5213636, %v420_v50  ;;  %v421_v58 = vmul.f32 %v855_v22, %v405_v52 }
  0x9c   : > { %951 = vst [vmem:[#allocation2 + $0x8] sm:$0xff] %v931_v53   ;;  %v422_v59 = vmul.f32 %v856_v25, %v406_v54  ;;  %v392_v60 = vmul.f32 %v858_v40, %v376_v55  ;;  %v407_v61 = vadd.f32 13.612261, %v391_v56 }
  0x9d   : > { %v936_v62 = vpack.c.bf16 %v436_v57, %v435_v51  ;;  %v437_v63 = vadd.f32 0.5213636, %v421_v58 }
  0x9e   : > { %v438_v0 = vadd.f32 0.5213636, %v422_v59  ;;  %v408_v1 = vadd.f32 13.612261, %v392_v60  ;;  %v423_v2 = vmul.f32 %v857_v27, %v407_v61 }
  0x9f   : > { %952 = vst [vmem:[#allocation2 + $0x20] sm:$0xff] %v936_v62  }
  0xa0   : > { %v941_v3 = vpack.c.bf16 %v438_v0, %v437_v63  ;;  %v424_v4 = vmul.f32 %v858_v40, %v408_v1  ;;  %v439_v5 = vadd.f32 0.5213636, %v423_v2 }
  0xa2   : > { %953 = vst [vmem:[#allocation2 + $0x28] sm:$0xff] %v941_v3   ;;  %v440_v6 = vadd.f32 0.5213636, %v424_v4 }
  0xa4   : > { %v946_v7 = vpack.c.bf16 %v440_v6, %v439_v5 }
  0xa6   : > { %954 = vst [vmem:[#allocation2 + $0x38] sm:$0xff] %v946_v7  }
  0xa7 PF: > { %v904_v10 = vld [vmem:[#allocation2 + $0x20] sm:$0xff]  ;;  %v903_v11 = vld [vmem:[#allocation2 + $0x8] sm:$0xff]  ;;  %v902_v12 = vld [vmem:[#allocation2 + $0x10] sm:$0xff]  ;;  %s1985_s13 = sld [smem:[#allocation19_spill]]  ;;  %s675_s4 = sshll.u32 %s1756_s24, 4  ;;  %s676_s4 = int_to_ptr.vmem [resolvable:$true] %s675_s4 }
  0xa8   : > { %v901_v13 = vld [vmem:[#allocation2 + $0x18] sm:$0xff]  ;;  %v900_v14 = vld [vmem:[#allocation2] sm:$0xff]  ;;  %v899_v15 = vld [vmem:[#allocation2 + $0x30] sm:$0xff]  ;;  %s1986_s11 = sld [smem:[#allocation20_spill]] }
  0xa9   : > { %v905_v9 = vld [vmem:[#allocation2 + $0x28] sm:$0xff]  ;;  %v473_v16 = vld [vmem:[%s1732_s29] sm:$0xff]  ;;  %v475_v28 = vld [vmem:[%s1732_s29 + $0x10] sm:$0xff]  ;;  %s1987_s12 = sld [smem:[#allocation21_spill]] }
  0xaa   : > { %v474_v17 = vld [vmem:[%s1732_s29 + $0x8] sm:$0xff]  ;;  %v477_v18 = vld [vmem:[%s1732_s29 + $0x20] sm:$0xff]  ;;  %v476_v29 = vld [vmem:[%s1732_s29 + $0x18] sm:$0xff]  ;;  %s1988_s9 = sld [smem:[#allocation33_spill]] }
  0xab   : > { %v478_v19 = vld [vmem:[%s1732_s29 + $0x28] sm:$0xff]  ;;  %v481_v20 = vld [vmem:[%s1732_s29 + $0x40] sm:$0xff]  ;;  %v489_v24 = vpack.c.bf16 %v474_v17, %v473_v16  ;;  %v479_v30 = vld [vmem:[%s1732_s29 + $0x30] sm:$0xff]  ;;  %v490_v36 = vpack.c.bf16 %v476_v29, %v475_v28 }
  0xac   : > { %v482_v21 = vld [vmem:[%s1732_s29 + $0x48] sm:$0xff]  ;;  %v485_v22 = vld [vmem:[%s1732_s29 + $0x60] sm:$0xff]  ;;  %v491_v25 = vpack.c.bf16 %v478_v19, %v477_v18  ;;  %v480_v31 = vld [vmem:[%s1732_s29 + $0x38] sm:$0xff] }
  0xad   : > { %v906_v8 = vld [vmem:[#allocation2 + $0x38] sm:$0xff]  ;;  %v486_v23 = vld [vmem:[%s1732_s29 + $0x68] sm:$0xff]  ;;  %v493_v26 = vpack.c.bf16 %v482_v21, %v481_v20  ;;  %v483_v32 = vld [vmem:[%s1732_s29 + $0x50] sm:$0xff]  ;;  %v492_v37 = vpack.c.bf16 %v480_v31, %v479_v30 }
  0xae   : > { %561 = vmatpush.bf16.msra.mxu0 %v906_v8  ;;  %955 = vmatpush.bf16.msra.mxu1 %v906_v8  ;;  %v495_v27 = vpack.c.bf16 %v486_v23, %v485_v22  ;;  %v484_v33 = vld [vmem:[%s1732_s29 + $0x58] sm:$0xff]  ;;  %v487_v34 = vld [vmem:[%s1732_s29 + $0x70] sm:$0xff]  ;;  %v610_v40 = vld [vmem:[%s1747_s21] sm:$0xff] }
  0xaf   : > { %956 = vmatpush.bf16.msra.mxu2 %v906_v8  ;;  %957 = vmatpush.bf16.msra.mxu3 %v906_v8  ;;  %v488_v35 = vld [vmem:[%s1732_s29 + $0x78] sm:$0xff]  ;;  %v494_v38 = vpack.c.bf16 %v484_v33, %v483_v32  ;;  %v614_v41 = vld [vmem:[%s1747_s21 + $0x20] sm:$0xff]  ;;  %v611_v48 = vld [vmem:[%s1747_s21 + $0x8] sm:$0xff]  ;;  %s907_s29 = sshll.u32 %s1985_s13, 5  ;;  %s894_s8 = sshll.u32 %s1987_s12, 6 }
  0xb0   : > { %v496_v39 = vpack.c.bf16 %v488_v35, %v487_v34  ;;  %v618_v46 = vld [vmem:[%s1747_s21 + $0x40] sm:$0xff]  ;;  %v615_v49 = vld [vmem:[%s1747_s21 + $0x28] sm:$0xff]  ;;  %v612_v60 = vld [vmem:[%s1747_s21 + $0x10] sm:$0xff]  ;;  %s670_s1 = sadd.s32 %s1986_s11, %s907_s29  ;;  %s659_s13 = scalar_lea.sflag [#allocation5], %s303_s15 }
  0xb1   : > { %v622_v47 = vld [vmem:[%s1747_s21 + $0x60] sm:$0xff]  ;;  %v619_v58 = vld [vmem:[%s1747_s21 + $0x48] sm:$0xff]  ;;  %v616_v61 = vld [vmem:[%s1747_s21 + $0x30] sm:$0xff]  ;;  %s672_s22 = sadd.s32 %s894_s8, %s670_s1  ;;  %s1271_s1 = scalar_lea.hbm %s1988_s9, 2048 }
  0xb2   : > { %562 = vmatpush.bf16.msra.mxu0 %v905_v9  ;;  %958 = vmatpush.bf16.msra.mxu1 %v905_v9  ;;  %v623_v59 = vld [vmem:[%s1747_s21 + $0x68] sm:$0xff]  ;;  %v620_v6 = vld [vmem:[%s1747_s21 + $0x50] sm:$0xff]  ;;  %v613_v8 = vld [vmem:[%s1747_s21 + $0x18] sm:$0xff]  ;;  %s895_s23 = sshll.u32 %s672_s22, 3 }
  0xb3   : > { %959 = vmatpush.bf16.msra.mxu2 %v905_v9  ;;  %960 = vmatpush.bf16.msra.mxu3 %v905_v9  ;;  %v624_v7 = vld [vmem:[%s1747_s21 + $0x70] sm:$0xff]  ;;  %v617_v9 = vld [vmem:[%s1747_s21 + $0x38] sm:$0xff]  ;;  %s674_s0 = scalar_lea.hbm %s1988_s9, %s895_s23 }
  0xb4   : > { %v621_v18 = vld [vmem:[%s1747_s21 + $0x58] sm:$0xff]  ;;  %s677_s7 = sshll.u32 %s674_s0, 4  ;;  %s678_s7 = int_to_ptr.hbm [resolvable:$true] %s677_s7 }
  0xb5   : > { %v625_v19 = vld [vmem:[%s1747_s21 + $0x78] sm:$0xff]  ;;  %s1265_s11 = sshra.s32 %s678_s7, 4  ;;  %s1266_s11 = int_to_ptr.hbm [resolvable:$true] %s1265_s11 }
  0xb6   : > { %563 = vmatpush.bf16.msra.mxu0 %v904_v10  ;;  %961 = vmatpush.bf16.msra.mxu1 %v904_v10  ;;  %s1267_s12 = scalar_lea.hbm %s1266_s11, 128  ;;  %p1272_p8 = scmp.lt.s32.totalorder %s1266_s11, %s1988_s9 }
  0xb7   : > { %962 = vmatpush.bf16.msra.mxu2 %v904_v10  ;;  %963 = vmatpush.bf16.msra.mxu3 %v904_v10  ;;  %p1268_p6 = scmp.ne.s32.totalorder %s1266_s11, %s1267_s12  ;;  %p1273_p2 = scmp.lt.s32.totalorder %s1271_s1, %s1267_s12 }
  0xb9   : > { %p1269_p7 = pnand %p1268_p6, %p1654_p10  ;;  %p1274_p5 = por %p1273_p2, %p1272_p8 }
  0xba   : > { %564 = vmatpush.bf16.msra.mxu0 %v903_v11  ;;  %964 = vmatpush.bf16.msra.mxu1 %v903_v11 }
  0xbb   : > { %965 = vmatpush.bf16.msra.mxu2 %v903_v11  ;;  %966 = vmatpush.bf16.msra.mxu3 %v903_v11  ;;  %p1270_p11 = pneg %p1269_p7 }
  0xbd   : > { %p1275_p4 = pnand %p1274_p5, %p1270_p11 }
  0xbe   : > { %565 = vmatpush.bf16.msra.mxu0 %v902_v12  ;;  %967 = vmatpush.bf16.msra.mxu1 %v902_v12 }
  0xbf   : > { %968 = vmatpush.bf16.msra.mxu2 %v902_v12  ;;  %969 = vmatpush.bf16.msra.mxu3 %v902_v12 }
  0xc2   : > { %566 = vmatpush.bf16.msra.mxu0 %v901_v13  ;;  %970 = vmatpush.bf16.msra.mxu1 %v901_v13 }
  0xc3   : > { %971 = vmatpush.bf16.msra.mxu2 %v901_v13  ;;  %972 = vmatpush.bf16.msra.mxu3 %v901_v13 }
  0xc6   : > { %567 = vmatpush.bf16.msra.mxu0 %v900_v14  ;;  %973 = vmatpush.bf16.msra.mxu1 %v900_v14 }
  0xc7   : > { %974 = vmatpush.bf16.msra.mxu2 %v900_v14  ;;  %975 = vmatpush.bf16.msra.mxu3 %v900_v14 }
  0xca   : > { %568 = vmatpush.bf16.msra.mxu0 %v899_v15  ;;  %976 = vmatpush.bf16.msra.mxu1 %v899_v15 }
  0xcb   : > { %977 = vmatpush.bf16.msra.mxu2 %v899_v15  ;;  %978 = vmatpush.bf16.msra.mxu3 %v899_v15 }
  0xcd   : > { %569 = vmatmul.bf16.vlgmr.msra.gmra.mxu0 %v489_v24  ;;  %579 = vmatmul.bf16.vlgmr.msra.gmra.mxu1 %v491_v25 }
  0xce   : > { %589 = vmatmul.bf16.vlgmr.msra.gmra.mxu2 %v493_v26  ;;  %599 = vmatmul.bf16.vlgmr.msra.gmra.mxu3 %v495_v27 }
  0xdd   : > { %574 = vmatmul.bf16.gmra.mxu0 %v490_v36  ;;  %584 = vmatmul.bf16.gmra.mxu1 %v492_v37 }
  0xde   : > { %594 = vmatmul.bf16.gmra.mxu2 %v494_v38  ;;  %604 = vmatmul.bf16.gmra.mxu3 %v496_v39 }
 0x14a   : > { %v570_v42 = vpop.f32.mrf.mxu0  ;;  %v580_v43 = vpop.f32.mrf.mxu1 }
 0x14b   : > { %v626_v44 = vmul.f32 %v610_v40, %v570_v42  ;;  %v630_v45 = vmul.f32 %v614_v41, %v580_v43 }
 0x14d   : > { %642 = vst [vmem:[%s1756_s24] sm:$0xff] %v626_v44 }
 0x14e   : > { %646 = vst [vmem:[%s1756_s24 + $0x20] sm:$0xff] %v630_v45 }
 0x151   : > { %v590_v50 = vpop.f32.mrf.mxu2  ;;  %v600_v51 = vpop.f32.mrf.mxu3 }
 0x152   : > { %v634_v52 = vmul.f32 %v618_v46, %v590_v50  ;;  %v638_v53 = vmul.f32 %v622_v47, %v600_v51  ;;  %v572_v54 = vpop.f32.mrf.mxu0  ;;  %v582_v55 = vpop.f32.mrf.mxu1 }
 0x153   : > { %v627_v56 = vmul.f32 %v611_v48, %v572_v54  ;;  %v631_v57 = vmul.f32 %v615_v49, %v582_v55 }
 0x154   : > { %650 = vst [vmem:[%s1756_s24 + $0x40] sm:$0xff] %v634_v52 }
 0x155   : > { %654 = vst [vmem:[%s1756_s24 + $0x60] sm:$0xff] %v638_v53 }
 0x156   : > { %643 = vst [vmem:[%s1756_s24 + $0x8] sm:$0xff] %v627_v56 }
 0x157   : > { %647 = vst [vmem:[%s1756_s24 + $0x28] sm:$0xff] %v631_v57 }
 0x159   : > { %v592_v62 = vpop.f32.mrf.mxu2  ;;  %v602_v63 = vpop.f32.mrf.mxu3 }
 0x15a   : > { %v635_v0 = vmul.f32 %v619_v58, %v592_v62  ;;  %v639_v1 = vmul.f32 %v623_v59, %v602_v63  ;;  %v575_v2 = vpop.f32.mrf.mxu0  ;;  %v585_v3 = vpop.f32.mrf.mxu1 }
 0x15b   : > { %v628_v4 = vmul.f32 %v612_v60, %v575_v2  ;;  %v632_v5 = vmul.f32 %v616_v61, %v585_v3 }
 0x15c   : > { %651 = vst [vmem:[%s1756_s24 + $0x48] sm:$0xff] %v635_v0 }
 0x15d   : > { %655 = vst [vmem:[%s1756_s24 + $0x68] sm:$0xff] %v639_v1 }
 0x15e   : > { %644 = vst [vmem:[%s1756_s24 + $0x10] sm:$0xff] %v628_v4 }
 0x15f   : > { %648 = vst [vmem:[%s1756_s24 + $0x30] sm:$0xff] %v632_v5 }
 0x161   : > { %v595_v10 = vpop.f32.mrf.mxu2  ;;  %v605_v11 = vpop.f32.mrf.mxu3 }
 0x162   : > { %v636_v12 = vmul.f32 %v620_v6, %v595_v10  ;;  %v640_v13 = vmul.f32 %v624_v7, %v605_v11  ;;  %v577_v14 = vpop.f32.mrf.mxu0  ;;  %v587_v15 = vpop.f32.mrf.mxu1 }
 0x163   : > { %v629_v16 = vmul.f32 %v613_v8, %v577_v14  ;;  %v633_v17 = vmul.f32 %v617_v9, %v587_v15 }
 0x164   : > { %652 = vst [vmem:[%s1756_s24 + $0x50] sm:$0xff] %v636_v12 }
 0x165   : > { %656 = vst [vmem:[%s1756_s24 + $0x70] sm:$0xff] %v640_v13 }
 0x166   : > { %645 = vst [vmem:[%s1756_s24 + $0x18] sm:$0xff] %v629_v16 }
 0x167   : > { %649 = vst [vmem:[%s1756_s24 + $0x38] sm:$0xff] %v633_v17 }
 0x169   : > { %v597_v20 = vpop.f32.mrf.mxu2  ;;  %v607_v21 = vpop.f32.mrf.mxu3 }
 0x16a   : > { %v637_v22 = vmul.f32 %v621_v18, %v597_v20  ;;  %v641_v23 = vmul.f32 %v625_v19, %v607_v21 }
 0x16c   : > { %653 = vst [vmem:[%s1756_s24 + $0x58] sm:$0xff] %v637_v22 }
 0x16d   : > { %657 = vst [vmem:[%s1756_s24 + $0x78] sm:$0xff] %v641_v23 }
 0x16e   : > { %1278 = shalt.err (!%p1275_p4)
}
 0x16f   : > { %s1450_s15 = smov 128   ;;  %s1451_s24 = smov 256  }
 0x170   : > { %s1452_s23 = smov 8  }
 0x171   : > { %985 = dma.vmem_to_hbm [thread:$0]  (%p1654_p10), %s676_s4, 2048, %s678_s7, %s659_s13, %s1450_s15, %s1451_s24, %s1452_s23  }
 0x172 PF: > { %s1991_s3 = sld [smem:[#allocation14_spill]]  ;;  %p1002_p9 = scmp.ge.s32.totalorder %s1445_s30, 2 }
 0x174   : > { %p998_p3 = pnand %p1002_p9, %p1669_p1 }
 0x176   : > { %p999_p12 = pneg %p998_p3 }
 0x178   : > { %s692_s26 = sand.u32 1, %s1991_s3  }
 0x179   : > { %s693_s0 = scalar_lea.sflag [#allocation5], %s692_s26 }
 0x17a   : > { %1368 = dma.done.wait (%p999_p12), %s693_s0, 2048  }
 0x17b   : > { %1370 = vsyncadd (%p999_p12), %s693_s0, 4294965248  ;;  %s22_s30 = sadd.s32 1, %s1445_s30   ;;  %s1993_s12 = sld [smem:[#allocation15_spill]] }
 0x17c   : > { %p1847_p13 = scmp.ge.s32.totalorder %s22_s30, 18   ;;  %s1994_s18 = sld [smem:[#allocation16_spill]] }
 0x17d   : > { %s1995_s4 = smov %s1681_s19  ;;  %s1996_s21 = sld [smem:[#allocation17_spill]] }
 0x17e   : > { %s1997_s22 = sld [smem:[#allocation18_spill]]  ;;  %s2002_s13 = smov %s1381_s14 }
 0x17f   : > { %s1998_s23 = sld [smem:[#allocation30_spill]]  ;;  %s2004_s14 = smov %s1685_s25 }
 0x180   : > { %s1999_s26 = sld [smem:[#allocation22_spill]]  ;;  %s2005_s15 = smov %s1389_s16 }
 0x181   : > { %s2000_s6 = sld [smem:[#allocation25_spill]]  ;;  %s2006_s16 = smov %s1393_s17 }
 0x182   : > { %s2001_s7 = sld [smem:[#allocation27_spill]]  ;;  %s2007_s17 = smov %s1703_s5 }
 0x183   : > { %s2003_s29 = sld [smem:[#allocation29_spill]]  ;;  %s2008_s19 = smov %s1405_s20 }
 0x184   : > { %s2009_s20 = smov %s1995_s4  ;;  %s2010_s24 = smov %s1433_s27 }
 0x185   : > { %s2011_s25 = smov %s1437_s28  ;;  %21 = sbr.rel (!%p1847_p13) target bundleno = 19 (0x13), region = 105 }
 0x187   : > { %s2012_s27 = smov %s2000_s6 }
 0x188   : > { %s2013_s28 = smov %s2001_s7 }
 0x18a   :  { %699 = vsyncpa [#allocation4], 1 }
 0x18b   :  { %701 = vsyncpa [#allocation4 + $0x1], 1 }
 0x18c   :  { %702 = vsyncpa [#allocation7], 1 }
 0x18d   :  { %704 = vsyncpa [#allocation7 + $0x1], 1 }
 0x18e   :  { %705 = vsyncpa [#allocation5], 1 }
 0x18f   :  { %707 = vsyncpa [#allocation5 + $0x1], 1 }

</bundles_post_ra>
